<compile_context>
chip_gen: v7x
topology: tpu7x:2x2x1
jax: 0.10.0
libtpu: 0.0.40
codegen_flags: <defaults>
</compile_context>

<pallas_src>
import numpy as np
import jax
import jax.numpy as jnp
from jax.experimental import pallas as pl
from jax.experimental.pallas import tpu as pltpu


# Generation-safe VMEM sizing: v5e default scoped VMEM = 16 MiB, v6e/v7x = 32 MiB,
# v7x physical = 64 MiB.  We raise the scoped limit explicitly and keep the
# double-buffered per-step block footprint well under the smallest physical budget.
_VMEM_LIMIT_BYTES = 48 * 1024 * 1024
_BLOCK_BYTES_BUDGET = 12 * 1024 * 1024   # single copy of (input + output) block


def _pick_c_blk(C: int, bytes_per_channel: int) -> int:
    """Largest divisor of C whose block fits the VMEM budget and keeps >= 2 grid steps."""
    max_by_vmem = max(1, _BLOCK_BYTES_BUDGET // max(1, bytes_per_channel))
    cap_for_two_cores = C // 2 if C >= 2 else 1   # keep parallel extent >= 2 (v7x megacore)
    target = max(1, min(int(max_by_vmem), cap_for_two_cores, C))
    for d in range(target, 0, -1):
        if C % d == 0:
            return d
    return 1


def shift_pallas(x: jax.Array, radius: int) -> jax.Array:
    """Pallas implementation of Shift.forward.

    x: (1, C, H, W)  ->  (1, C * (2r+1)^2, H - 2r, W - 2r)
    """
    B, C, H, W = x.shape
    assert B == 1, "Shift.forward's .view() requires batch == 1"
    k = 2 * radius + 1
    kk = k * k
    Ho = H - 2 * radius
    Wo = W - 2 * radius
    assert Ho > 0 and Wo > 0, "radius too large for the spatial extent"

    itemsize = jnp.dtype(x.dtype).itemsize
    bytes_per_channel = itemsize * (H * W + kk * Ho * Wo)   # in + out bytes per channel
    c_blk = _pick_c_blk(C, bytes_per_channel)
    grid = (C // c_blk,)

    # Lane shifts go to the XLU explicitly when W is lane-aligned; otherwise fall
    # back to static lane-offset slices of the already-loaded value.
    use_roll = (W % 128 == 0)

    def kernel(x_ref, o_ref):
        # x_ref: (c_blk, H, W) input slab; o_ref: (c_blk, kk, Ho, Wo) output slab.
        xb = x_ref[...]                       # load the whole slab once
        for kj in range(k):
            if kj == 0:
                xc = xb[:, :, :Wo]
            elif use_roll:
                # Roll left by kj on the XLU; wrapped lanes land at columns
                # >= W - kj >= Wo and are discarded by the [:Wo] slice.
                xc = pltpu.roll(xb, shift=W - kj, axis=-1)[:, :, :Wo]
            else:
                # One static lane-offset slice per kj, hoisted out of the ki loop.
                xc = xb[:, :, kj:kj + Wo]
            for ki in range(k):
                # ki only moves the sublane window: cheap static pick + store.
                o_ref[:, ki * k + kj, :, :] = xc[:, ki:ki + Ho, :]

    out = pl.pallas_call(
        kernel,
        # Declare the output as (C, kk, Ho, Wo): each grid step writes one
        # contiguous HBM range; the final NCHW view below is a free reshape.
        out_shape=jax.ShapeDtypeStruct((C, kk, Ho, Wo), x.dtype),
        grid_spec=pltpu.PrefetchScalarGridSpec(
            num_scalar_prefetch=0,
            grid=grid,
            in_specs=[
                # c_blk channels of the full (H, W) plane per grid step (batch squeezed).
                pl.BlockSpec((None, c_blk, H, W), lambda c: (0, c, 0, 0)),
            ],
            out_specs=pl.BlockSpec((c_blk, kk, Ho, Wo), lambda c: (c, 0, 0, 0)),
        ),
        compiler_params=pltpu.CompilerParams(
            dimension_semantics=("parallel",),
            vmem_limit_bytes=_VMEM_LIMIT_BYTES,
        ),
    )(x)
    return out.reshape(1, C * kk, Ho, Wo)


def shift_reference(x: np.ndarray, radius: int) -> np.ndarray:
    """Pure numpy reference reproducing F.unfold + view semantics."""
    B, C, H, W = x.shape
    k = 2 * radius + 1
    kk = k * k
    Ho, Wo = H - 2 * radius, W - 2 * radius
    out = np.zeros((1, C * kk, Ho, Wo), dtype=x.dtype)
    for c in range(C):
        for ki in range(k):
            for kj in range(k):
                out[0, c * kk + ki * k + kj] = x[0, c, ki:ki + Ho, kj:kj + Wo]
    return out


if __name__ == "__main__":
    key = jax.random.PRNGKey(0)
    cases = [
        # (radius, B, C, H, W, dtype)
        (1, 1, 4, 16, 16, jnp.float32),    # kernel_size=3, n_patches=9
        (1, 1, 4, 16, 16, jnp.bfloat16),   # packed-sublane dtype coverage
        (2, 1, 3, 16, 16, jnp.float32),    # kernel_size=5, non-power-of-two C
    ]
    for radius, B, C, H, W, dtype in cases:
        key, sub = jax.random.split(key)
        x = jax.random.normal(sub, (B, C, H, W), dtype=dtype)
        y = jax.block_until_ready(shift_pallas(x, radius))
        y_ref = shift_reference(np.asarray(x), radius)
        assert y.shape == y_ref.shape, (y.shape, y_ref.shape)
        np.testing.assert_array_equal(
            np.asarray(y, dtype=np.float32), y_ref.astype(np.float32)
        )
    print("KERNEL_OK")
</pallas_src>

<mosaic_0001>
module attributes {stable_mosaic.version = 11 : i64} {
  func.func @kernel(%arg0: i32, %arg1: memref<1x2x16x16xf32, #tpu.memory_space<vmem>>, %arg2: memref<2x9x14x14xf32, #tpu.memory_space<vmem>>) attributes {dimension_semantics = [#tpu.dimension_semantics<parallel>], iteration_bounds = array<i64: 2>, scalar_prefetch = 0 : i64, scratch_operands = 0 : i64, tpu.core_type = #tpu.core_type<tc>, window_params = [{transform_indices = @transform_0, window_bounds = array<i64: 1, 2, 16, 16>}, {transform_indices = @transform_1, window_bounds = array<i64: 2, 9, 14, 14>}]} {
    %c0 = arith.constant 0 : index
    %c0_0 = arith.constant 0 : index
    %c0_1 = arith.constant 0 : index
    %c0_2 = arith.constant 0 : index
    %0 = vector.load %arg1[%c0, %c0_0, %c0_1, %c0_2] : memref<1x2x16x16xf32, #tpu.memory_space<vmem>>, vector<1x2x16x16xf32>
    %1 = vector.shape_cast %0 : vector<1x2x16x16xf32> to vector<2x16x16xf32>
    %2 = vector.extract_strided_slice %1 {offsets = [0, 0, 0], sizes = [2, 16, 14], strides = [1, 1, 1]} : vector<2x16x16xf32> to vector<2x16x14xf32>
    %3 = vector.extract_strided_slice %2 {offsets = [0, 0, 0], sizes = [2, 14, 14], strides = [1, 1, 1]} : vector<2x16x14xf32> to vector<2x14x14xf32>
    %c0_3 = arith.constant 0 : index
    %c0_4 = arith.constant 0 : index
    %c0_5 = arith.constant 0 : index
    %c0_6 = arith.constant 0 : index
    %4 = vector.load %arg2[%c0_3, %c0_4, %c0_5, %c0_6] : memref<2x9x14x14xf32, #tpu.memory_space<vmem>>, vector<2x1x14x14xf32>
    %5 = vector.shape_cast %4 : vector<2x1x14x14xf32> to vector<2x14x14xf32>
    %6 = vector.shape_cast %3 : vector<2x14x14xf32> to vector<2x1x14x14xf32>
    tpu.vector_store %arg2[%c0_3, %c0_4, %c0_5, %c0_6], %6 {strides = array<i32>} : memref<2x9x14x14xf32, #tpu.memory_space<vmem>>, vector<2x1x14x14xf32>,
    %7 = vector.extract_strided_slice %2 {offsets = [0, 1, 0], sizes = [2, 14, 14], strides = [1, 1, 1]} : vector<2x16x14xf32> to vector<2x14x14xf32>
    %c0_7 = arith.constant 0 : index
    %c3 = arith.constant 3 : index
    %c0_8 = arith.constant 0 : index
    %c0_9 = arith.constant 0 : index
    %8 = vector.load %arg2[%c0_7, %c3, %c0_8, %c0_9] : memref<2x9x14x14xf32, #tpu.memory_space<vmem>>, vector<2x1x14x14xf32>
    %9 = vector.shape_cast %8 : vector<2x1x14x14xf32> to vector<2x14x14xf32>
    %10 = vector.shape_cast %7 : vector<2x14x14xf32> to vector<2x1x14x14xf32>
    tpu.vector_store %arg2[%c0_7, %c3, %c0_8, %c0_9], %10 {strides = array<i32>} : memref<2x9x14x14xf32, #tpu.memory_space<vmem>>, vector<2x1x14x14xf32>,
    %11 = vector.extract_strided_slice %2 {offsets = [0, 2, 0], sizes = [2, 14, 14], strides = [1, 1, 1]} : vector<2x16x14xf32> to vector<2x14x14xf32>
    %c0_10 = arith.constant 0 : index
    %c6 = arith.constant 6 : index
    %c0_11 = arith.constant 0 : index
    %c0_12 = arith.constant 0 : index
    %12 = vector.load %arg2[%c0_10, %c6, %c0_11, %c0_12] : memref<2x9x14x14xf32, #tpu.memory_space<vmem>>, vector<2x1x14x14xf32>
    %13 = vector.shape_cast %12 : vector<2x1x14x14xf32> to vector<2x14x14xf32>
    %14 = vector.shape_cast %11 : vector<2x14x14xf32> to vector<2x1x14x14xf32>
    tpu.vector_store %arg2[%c0_10, %c6, %c0_11, %c0_12], %14 {strides = array<i32>} : memref<2x9x14x14xf32, #tpu.memory_space<vmem>>, vector<2x1x14x14xf32>,
    %15 = vector.extract_strided_slice %1 {offsets = [0, 0, 1], sizes = [2, 16, 14], strides = [1, 1, 1]} : vector<2x16x16xf32> to vector<2x16x14xf32>
    %16 = vector.extract_strided_slice %15 {offsets = [0, 0, 0], sizes = [2, 14, 14], strides = [1, 1, 1]} : vector<2x16x14xf32> to vector<2x14x14xf32>
    %c0_13 = arith.constant 0 : index
    %c1 = arith.constant 1 : index
    %c0_14 = arith.constant 0 : index
    %c0_15 = arith.constant 0 : index
    %17 = vector.load %arg2[%c0_13, %c1, %c0_14, %c0_15] : memref<2x9x14x14xf32, #tpu.memory_space<vmem>>, vector<2x1x14x14xf32>
    %18 = vector.shape_cast %17 : vector<2x1x14x14xf32> to vector<2x14x14xf32>
    %19 = vector.shape_cast %16 : vector<2x14x14xf32> to vector<2x1x14x14xf32>
    tpu.vector_store %arg2[%c0_13, %c1, %c0_14, %c0_15], %19 {strides = array<i32>} : memref<2x9x14x14xf32, #tpu.memory_space<vmem>>, vector<2x1x14x14xf32>,
    %20 = vector.extract_strided_slice %15 {offsets = [0, 1, 0], sizes = [2, 14, 14], strides = [1, 1, 1]} : vector<2x16x14xf32> to vector<2x14x14xf32>
    %c0_16 = arith.constant 0 : index
    %c4 = arith.constant 4 : index
    %c0_17 = arith.constant 0 : index
    %c0_18 = arith.constant 0 : index
    %21 = vector.load %arg2[%c0_16, %c4, %c0_17, %c0_18] : memref<2x9x14x14xf32, #tpu.memory_space<vmem>>, vector<2x1x14x14xf32>
    %22 = vector.shape_cast %21 : vector<2x1x14x14xf32> to vector<2x14x14xf32>
    %23 = vector.shape_cast %20 : vector<2x14x14xf32> to vector<2x1x14x14xf32>
    tpu.vector_store %arg2[%c0_16, %c4, %c0_17, %c0_18], %23 {strides = array<i32>} : memref<2x9x14x14xf32, #tpu.memory_space<vmem>>, vector<2x1x14x14xf32>,
    %24 = vector.extract_strided_slice %15 {offsets = [0, 2, 0], sizes = [2, 14, 14], strides = [1, 1, 1]} : vector<2x16x14xf32> to vector<2x14x14xf32>
    %c0_19 = arith.constant 0 : index
    %c7 = arith.constant 7 : index
    %c0_20 = arith.constant 0 : index
    %c0_21 = arith.constant 0 : index
    %25 = vector.load %arg2[%c0_19, %c7, %c0_20, %c0_21] : memref<2x9x14x14xf32, #tpu.memory_space<vmem>>, vector<2x1x14x14xf32>
    %26 = vector.shape_cast %25 : vector<2x1x14x14xf32> to vector<2x14x14xf32>
    %27 = vector.shape_cast %24 : vector<2x14x14xf32> to vector<2x1x14x14xf32>
    tpu.vector_store %arg2[%c0_19, %c7, %c0_20, %c0_21], %27 {strides = array<i32>} : memref<2x9x14x14xf32, #tpu.memory_space<vmem>>, vector<2x1x14x14xf32>,
    %28 = vector.extract_strided_slice %1 {offsets = [0, 0, 2], sizes = [2, 16, 14], strides = [1, 1, 1]} : vector<2x16x16xf32> to vector<2x16x14xf32>
    %29 = vector.extract_strided_slice %28 {offsets = [0, 0, 0], sizes = [2, 14, 14], strides = [1, 1, 1]} : vector<2x16x14xf32> to vector<2x14x14xf32>
    %c0_22 = arith.constant 0 : index
    %c2 = arith.constant 2 : index
    %c0_23 = arith.constant 0 : index
    %c0_24 = arith.constant 0 : index
    %30 = vector.load %arg2[%c0_22, %c2, %c0_23, %c0_24] : memref<2x9x14x14xf32, #tpu.memory_space<vmem>>, vector<2x1x14x14xf32>
    %31 = vector.shape_cast %30 : vector<2x1x14x14xf32> to vector<2x14x14xf32>
    %32 = vector.shape_cast %29 : vector<2x14x14xf32> to vector<2x1x14x14xf32>
    tpu.vector_store %arg2[%c0_22, %c2, %c0_23, %c0_24], %32 {strides = array<i32>} : memref<2x9x14x14xf32, #tpu.memory_space<vmem>>, vector<2x1x14x14xf32>,
    %33 = vector.extract_strided_slice %28 {offsets = [0, 1, 0], sizes = [2, 14, 14], strides = [1, 1, 1]} : vector<2x16x14xf32> to vector<2x14x14xf32>
    %c0_25 = arith.constant 0 : index
    %c5 = arith.constant 5 : index
    %c0_26 = arith.constant 0 : index
    %c0_27 = arith.constant 0 : index
    %34 = vector.load %arg2[%c0_25, %c5, %c0_26, %c0_27] : memref<2x9x14x14xf32, #tpu.memory_space<vmem>>, vector<2x1x14x14xf32>
    %35 = vector.shape_cast %34 : vector<2x1x14x14xf32> to vector<2x14x14xf32>
    %36 = vector.shape_cast %33 : vector<2x14x14xf32> to vector<2x1x14x14xf32>
    tpu.vector_store %arg2[%c0_25, %c5, %c0_26, %c0_27], %36 {strides = array<i32>} : memref<2x9x14x14xf32, #tpu.memory_space<vmem>>, vector<2x1x14x14xf32>,
    %37 = vector.extract_strided_slice %28 {offsets = [0, 2, 0], sizes = [2, 14, 14], strides = [1, 1, 1]} : vector<2x16x14xf32> to vector<2x14x14xf32>
    %c0_28 = arith.constant 0 : index
    %c8 = arith.constant 8 : index
    %c0_29 = arith.constant 0 : index
    %c0_30 = arith.constant 0 : index
    %38 = vector.load %arg2[%c0_28, %c8, %c0_29, %c0_30] : memref<2x9x14x14xf32, #tpu.memory_space<vmem>>, vector<2x1x14x14xf32>
    %39 = vector.shape_cast %38 : vector<2x1x14x14xf32> to vector<2x14x14xf32>
    %40 = vector.shape_cast %37 : vector<2x14x14xf32> to vector<2x1x14x14xf32>
    tpu.vector_store %arg2[%c0_28, %c8, %c0_29, %c0_30], %40 {strides = array<i32>} : memref<2x9x14x14xf32, #tpu.memory_space<vmem>>, vector<2x1x14x14xf32>,
    return
  }
  func.func @transform_0(%arg0: i32) -> (i32, i32, i32, i32) {
    %c0_i32 = arith.constant 0 : i32
    %c0_i32_0 = arith.constant 0 : i32
    %c0_i32_1 = arith.constant 0 : i32
    %c0_i32_2 = arith.constant 0 : i32
    return %c0_i32, %arg0, %c0_i32_0, %c0_i32_1 : i32, i32, i32, i32
  }
  func.func @transform_1(%arg0: i32) -> (i32, i32, i32, i32) {
    %c0_i32 = arith.constant 0 : i32
    %c0_i32_0 = arith.constant 0 : i32
    %c0_i32_1 = arith.constant 0 : i32
    %c0_i32_2 = arith.constant 0 : i32
    return %arg0, %c0_i32, %c0_i32_0, %c0_i32_1 : i32, i32, i32, i32
  }
}

</mosaic_0001>

<bundles_post_ra>
// kernel: tpu_custom_call.1
= control target key start
LH: loop header
LB: loop body
LE: loop exit
PB: predicated region body
PF: predicated region fallthrough
CT: control target
= control target key end

     0   :  { %6 = vsyncpa [#allocation3], 0  ;;  %s646_s0 = inlined_call_operand.hbm [shape: f32[1,4,16,16], index: 0, kind: input, shape index: {}]   ;;  %s647_s1 = inlined_call_operand.vmem [shape: f32[4,9,14,14], index: 1, kind: output, shape index: {}]  }
   0x1   :  { %8 = vsyncpa [#allocation3 + $0x1], 0  ;;  %s465_s6 = smov 0   ;;  %s467_s7 = smov 0  }
   0x2   :  { %s469_s8 = smov 0   ;;  %s471_s9 = smov 0  }
   0x3 LB: > { %s292_s10 = sadd.s32 4294967295, %s448_s9   ;;  %s485_s11 = sadd.s32 1, %s448_s9   ;;  %s448_s9 = sphi %s471_s9, %s654_s9   ;;  %s444_s8 = sphi %s469_s8, %s653_s8   ;;  %s440_s7 = sphi %s467_s7, %s652_s7   ;;  %s436_s6 = sphi %s465_s6, %s651_s6  }
   0x4   : > { %s18_s12 = ssub.s32 %s448_s9, %s485_s11  ;;  %s21_s13 = sadd.s32 1, %s444_s8 }
   0x5   : > { %p19_p0 = scmp.eq.s32.totalorder %s18_s12, 0  ;;  %p28_p1 = scmp.ne.s32.totalorder %s444_s8, %s440_s7 }
   0x6   : > { %p29_p2 = scmp.eq.s32.totalorder %s448_s9, 0  ;;  %p34_p3 = scmp.ne.s32.totalorder %s440_s7, %s436_s6 }
   0x7   : > { %s495_s14 = scalar_select %p19_p0, %s444_s8, %s21_s13  }
   0x8   : > { %p30_p4 = por %p29_p2, %p28_p1  ;;  %p35_p5 = scmp.eq.s32.totalorder %s292_s10, 0 }
   0x9   : > { %p347_p6 = scmp.lt.s32.totalorder %s448_s9, 2  ;;  %s84_s16 = sand.u32 1, %s444_s8  }
   0xa   : > { %p500_p7 = por %p35_p5, %p34_p3  ;;  %s296_s17 = sshll.u32 %s84_s16, 5 }
   0xb   : > { %s339_s18 = sshll.u32 %s448_s9, 9  ;;  %s88_s22 = scalar_lea.vmem [#allocation2], %s296_s17 }
   0xc   : > { %s509_s21 = scalar_lea.hbm %s646_s0, %s339_s18  ;;  %s96_s23 = sshll.u32 %s88_s22, 4  ;;  %s511_s23 = int_to_ptr.vmem [resolvable:$true] %s96_s23 }
   0xd   : > { %p513_p8 = pnand %p347_p6, %p30_p4  ;;  %s518_s25 = scalar_lea.sflag [#allocation3], %s84_s16 }
   0xe   : > { %s384_s26 = scalar_lea.hbm %s509_s21, 512  ;;  %s389_s29 = scalar_lea.hbm %s646_s0, 1024 }
   0xf   : > { %p385_p10 = scmp.ne.s32.totalorder %s509_s21, %s384_s26  ;;  %p386_p11 = pneg %p513_p8 }
  0x10   : > { %p390_p0 = scmp.lt.u32.totalorder %s509_s21, %s646_s0  ;;  %p391_p1 = scmp.lt.u32.totalorder %s389_s29, %s384_s26 }
  0x11   : > { %p387_p12 = pnand %p386_p11, %p385_p10  ;;  %p393_p3 = scmp.lt.u32.totalorder %s384_s26, %s509_s21 }
  0x12   : > { %p392_p2 = por %p391_p1, %p390_p0 }
  0x13   : > { %p388_p13 = pneg %p387_p12 }
  0x14   : > { %p394_p4 = por %p393_p3, %p392_p2 }
  0x16   : > { %p395_p5 = pnand %p394_p4, %p388_p13 }
  0x18   : > { %398 = shalt.err (!%p395_p5)
}
  0x19   : > { %s399_s3 = scalar_lea.vmem %s511_s23, 512  ;;  %s450_s4 = smov [#allocation2]  }
  0x1a   : > { %p400_p6 = scmp.ne.s32.totalorder %s511_s23, %s399_s3  ;;  %s404_s5 = sshll.u32 %s450_s4, 4  ;;  %s405_s5 = int_to_ptr.vmem [resolvable:$false] %s404_s5 }
  0x1b   : > { %s406_s6 = scalar_lea.vmem %s405_s5, 1024  ;;  %p407_p9 = scmp.lt.s32.totalorder %s511_s23, %s405_s5 }
  0x1c   : > { %p402_p10 = pnand %p400_p6, %p386_p11  ;;  %p408_p0 = scmp.lt.s32.totalorder %s406_s6, %s399_s3 }
  0x1e   : > { %p403_p12 = pneg %p402_p10  ;;  %p409_p1 = por %p408_p0, %p407_p9 }
  0x20   : > { %p410_p2 = pnand %p409_p1, %p403_p12 }
  0x22   : > { %413 = shalt.err (!%p410_p2)
}
  0x23   : > { %s451_s12 = smov 128   ;;  %s452_s13 = smov 8  }
  0x24   : > { %346 = dma.hbm_to_vmem [thread:$0]  (!%p513_p8), %s509_s21, 512, %s511_s23, %s518_s25, %s451_s12, %s451_s12, %s452_s13  }
  0x25   : > { %p104_p11 = scmp.lt.s32.totalorder %s448_s9, 3  ;;  %p650_p13 = scmp.ge.s32.totalorder %s448_s9, 1 }
  0x27   : > { %p105_p3 = pnand %p650_p13, %p104_p11 }
  0x28   : > { %s110_s16 = sand.u32 (!%p105_p3), 1, %s440_s7  }
  0x29   : > { %108 = sbr.rel (%p105_p3) target bundleno = 184 (0xb8), region = 24  ;;  %s301_s17 = sshll.u32 (!%p105_p3), %s110_s16, 5 }
  0x2a   : > { %s111_s18 = scalar_lea.sflag (!%p105_p3), [#allocation3], %s110_s16  ;;  %s114_s19 = scalar_lea.vmem (!%p105_p3), [#allocation2], %s301_s17 }
  0x30   : > { %431 = dma.done.wait (%p500_p7), %s111_s18, 512  }
  0x31   : > { %433 = vsyncadd (%p500_p7), %s111_s18, 4294966784  ;;  %s302_s20 = sshll.u32 %s292_s10, 1  ;;  %vm146_vm0 = vcmask 113664   ;;  %v142_v0 = vld [vmem:[%s114_s19] sm:$0xff]  ;;  %vm153_vm1 = vcmask 113665   ;;  %vm160_vm2 = vcmask 113666  }
  0x32   : > { %p136_p9 = scmp.lt.s32.totalorder %s302_s20, 3  ;;  %v143_v1 = vld [vmem:[%s114_s19 + $0x8] sm:$0xff]  ;;  %vm148_vm3 = vcmask 111616   ;;  %vm155_vm4 = vcmask 112640   ;;  %s453_s9 = smov 126   ;;  %v145_v2 = vld [vmem:[%s114_s19 + $0x18] sm:$0xff] }
  0x33   : > { %196 = vrot.lane.b32.xlu1 %v142_v0, %s453_s9  ;;  %s454_s10 = smov 127   ;;  %v144_v3 = vld [vmem:[%s114_s19 + $0x10] sm:$0xff] }
  0x34   : > { %s656_s20 = smov (!%p136_p9, %s302_s20), 3  ;;  %169 = vrot.lane.b32.xlu0 %v142_v0, %s454_s10 }
  0x35   : > { %s340_s21 = smul.u32 144, %s656_s20 }
  0x37   : > { %s559_s24 = scalar_lea.vmem %s647_s1, %s340_s21  ;;  %198 = vrot.lane.b32.xlu1 %v143_v1, %s453_s9 }
  0x38   : > { %147 = vst.msk [vmem:[%s559_s24] sm:$0xff] %vm146_vm0, %v142_v0  ;;  %309 = vst.msk [vmem:[%s559_s24 + $0x66] sm:$0xff] %vm146_vm0, %v143_v1  ;;  %171 = vrot.lane.b32.xlu0 %v143_v1, %s454_s10 }
  0x39   : > { %304 = vst.msk [vmem:[%s559_s24 + $0x2f] sm:$0xfe] %vm153_vm1, %v142_v0  ;;  %306 = vst.msk [vmem:[%s559_s24 + $0xbf] sm:$0xfe] %vm153_vm1, %v144_v3 }
  0x3a   : > { %308 = vst.msk [vmem:[%s559_s24 + $0x5e] sm:$0xfc] %vm160_vm2, %v142_v0  ;;  %310 = vst.msk [vmem:[%s559_s24 + $0xee] sm:$0xfc] %vm160_vm2, %v144_v3 }
  0x3b   : > { %149 = vst.msk [vmem:[%s559_s24 + $0x8] sm:$0x3f] %vm148_vm3, %v143_v1  ;;  %151 = vst.msk [vmem:[%s559_s24 + $0x98] sm:$0x3f] %vm148_vm3, %v145_v2  ;;  %175 = vrot.lane.b32.xlu1 %v145_v2, %s454_s10 }
  0x3c   : > { %305 = vst.msk [vmem:[%s559_s24 + $0x37] sm:$0x7f] %vm155_vm4, %v143_v1  ;;  %307 = vst.msk [vmem:[%s559_s24 + $0xc7] sm:$0x7f] %vm155_vm4, %v145_v2  ;;  %173 = vrot.lane.b32.xlu0 %v144_v3, %s454_s10 }
  0x3d   : > { %311 = vst.msk [vmem:[%s559_s24 + $0xf6] sm:$0xff] %vm146_vm0, %v145_v2  ;;  %150 = vst.msk [vmem:[%s559_s24 + $0x90] sm:$0xff] %vm146_vm0, %v144_v3 }
  0x3f   : > { %202 = vrot.lane.b32.xlu1 %v145_v2, %s453_s9 }
  0x40   : > { %200 = vrot.lane.b32.xlu0 %v144_v3, %s453_s9 }
  0xa5   : > { %v197_v4 = vpop.permute.xlu1 %196 }
  0xa6   : > { %v170_v5 = vpop.permute.xlu0 %169  ;;  %324 = vst.msk [vmem:[%s559_s24 + $0x20] sm:$0xff] %vm146_vm0, %v197_v4 }
  0xa7   : > { %328 = vst.msk [vmem:[%s559_s24 + $0x4f] sm:$0xfe] %vm153_vm1, %v197_v4  ;;  %316 = vst.msk [vmem:[%s559_s24 + $0x3f] sm:$0xfe] %vm153_vm1, %v170_v5 }
  0xa8   : > { %332 = vst.msk [vmem:[%s559_s24 + $0x7e] sm:$0xfc] %vm160_vm2, %v197_v4  ;;  %320 = vst.msk [vmem:[%s559_s24 + $0x6e] sm:$0xfc] %vm160_vm2, %v170_v5 }
  0xa9   : > { %312 = vst.msk [vmem:[%s559_s24 + $0x10] sm:$0xff] %vm146_vm0, %v170_v5  ;;  %v199_v6 = vpop.permute.xlu1 %198 }
  0xaa   : > { %v172_v7 = vpop.permute.xlu0 %171  ;;  %325 = vst.msk [vmem:[%s559_s24 + $0x28] sm:$0x3f] %vm148_vm3, %v199_v6 }
  0xab   : > { %329 = vst.msk [vmem:[%s559_s24 + $0x57] sm:$0x7f] %vm155_vm4, %v199_v6  ;;  %317 = vst.msk [vmem:[%s559_s24 + $0x47] sm:$0x7f] %vm155_vm4, %v172_v7 }
  0xac   : > { %333 = vst.msk [vmem:[%s559_s24 + $0x86] sm:$0xff] %vm146_vm0, %v199_v6  ;;  %321 = vst.msk [vmem:[%s559_s24 + $0x76] sm:$0xff] %vm146_vm0, %v172_v7 }
  0xad   : > { %313 = vst.msk [vmem:[%s559_s24 + $0x18] sm:$0x3f] %vm148_vm3, %v172_v7  ;;  %v176_v8 = vpop.permute.xlu1 %175 }
  0xae   : > { %v174_v9 = vpop.permute.xlu0 %173  ;;  %315 = vst.msk [vmem:[%s559_s24 + $0xa8] sm:$0x3f] %vm148_vm3, %v176_v8 }
  0xaf   : > { %319 = vst.msk [vmem:[%s559_s24 + $0xd7] sm:$0x7f] %vm155_vm4, %v176_v8 }
  0xb0   : > { %323 = vst.msk [vmem:[%s559_s24 + $0x106] sm:$0xff] %vm146_vm0, %v176_v8  ;;  %314 = vst.msk [vmem:[%s559_s24 + $0xa0] sm:$0xff] %vm146_vm0, %v174_v9 }
  0xb1   : > { %318 = vst.msk [vmem:[%s559_s24 + $0xcf] sm:$0xfe] %vm153_vm1, %v174_v9  ;;  %v203_v10 = vpop.permute.xlu1 %202 }
  0xb2   : > { %322 = vst.msk [vmem:[%s559_s24 + $0xfe] sm:$0xfc] %vm160_vm2, %v174_v9  ;;  %v201_v11 = vpop.permute.xlu0 %200 }
  0xb3   : > { %327 = vst.msk [vmem:[%s559_s24 + $0xb8] sm:$0x3f] %vm148_vm3, %v203_v10 }
  0xb4   : > { %331 = vst.msk [vmem:[%s559_s24 + $0xe7] sm:$0x7f] %vm155_vm4, %v203_v10 }
  0xb5   : > { %335 = vst.msk [vmem:[%s559_s24 + $0x116] sm:$0xff] %vm146_vm0, %v203_v10  ;;  %326 = vst.msk [vmem:[%s559_s24 + $0xb0] sm:$0xff] %vm146_vm0, %v201_v11 }
  0xb6   : > { %330 = vst.msk [vmem:[%s559_s24 + $0xdf] sm:$0xfe] %vm153_vm1, %v201_v11 }
  0xb7   : > { %334 = vst.msk [vmem:[%s559_s24 + $0x10e] sm:$0xfc] %vm160_vm2, %v201_v11 }
  0xb8 PF: > { %p11_p7 = scmp.ge.s32.totalorder %s485_s11, 4   ;;  %s651_s6 = smov %s440_s7 }
  0xb9   : > { %s652_s7 = smov %s444_s8  ;;  %s653_s8 = smov %s495_s14 }
  0xba   : > { %s654_s9 = smov %s485_s11  ;;  %13 = sbr.rel (!%p11_p7) target bundleno = 3 (0x3), region = 72 }
  0xc1   :  { %247 = vsyncpa [#allocation3], 1 }
  0xc2   :  { %249 = vsyncpa [#allocation3 + $0x1], 1 }

</bundles_post_ra>
